<compile_context>
chip_gen: v5e
topology: v5e:2x2
jax: 0.10.0
libtpu: 0.0.40
codegen_flags: <defaults>
</compile_context>

<pallas_src>
import math

import jax
import jax.numpy as jnp
import numpy as np
from jax import lax
from jax.experimental import pallas as pl
from jax.experimental.pallas import tpu as pltpu

K = 3  # conv kernel size of StyleConv1dLayer


# --------------------------------------------------------------------------
# Helpers
# --------------------------------------------------------------------------
def _full_spec(shape):
    """BlockSpec covering the whole array (grid is a single step)."""
    nd = len(shape)
    return pl.BlockSpec(tuple(shape), lambda i, _nd=nd: (0,) * _nd)


def _upsample_matrix(B, L_in):
    """Constant 0/1 matrix U of shape (B*L_in, 2*B*L_in).

    x (Cin, B*L_in) @ U gives the per-sample x2 nearest-neighbour upsampled slab,
    block-diagonal over batch so samples never mix.
    """
    L_out = 2 * L_in
    u = np.zeros((B * L_in, B * L_out), np.float32)
    for b in range(B):
        for m in range(L_in):
            u[b * L_in + m, b * L_out + 2 * m] = 1.0
            u[b * L_in + m, b * L_out + 2 * m + 1] = 1.0
    return jnp.asarray(u)


def _boundary_masks(B, L_out):
    """Per-sample zero-padding masks for the shifted conv taps, shape (1, B*L_out)."""
    mf = np.ones((1, B * L_out), np.float32)
    mf[0, ::L_out] = 0.0                      # zero where per-sample position == 0
    ml = np.ones((1, B * L_out), np.float32)
    ml[0, L_out - 1::L_out] = 0.0             # zero where per-sample position == L_out-1
    return jnp.asarray(mf), jnp.asarray(ml)


# --------------------------------------------------------------------------
# Fused generator kernel (one launch for the whole network)
# --------------------------------------------------------------------------
def _make_generator_kernel(upsample_flags):
    """refs = [x,
               (smat, dmat, w(K,Co,Ci), b, mask_first, mask_last [, U]) per layer,
               w_out, b_out, out]."""
    sqrt2 = math.sqrt(2.0)

    def kernel(*refs):
        idx = 0
        x = refs[idx][...].astype(jnp.float32)            # (C0, B*L0)
        idx += 1

        for up in upsample_flags:
            smat_ref = refs[idx]
            dmat_ref = refs[idx + 1]
            w_ref = refs[idx + 2]
            b_ref = refs[idx + 3]
            mf_ref = refs[idx + 4]
            ml_ref = refs[idx + 5]
            idx += 6

            # modulate input channels (equivalent to modulating the weights)
            xm = x * smat_ref[...]                        # (Cin, B*L_in)

            if up:
                u_ref = refs[idx]
                idx += 1
                # x2 nearest upsample via constant 0/1 interleave matmul (MXU)
                xm = jnp.dot(xm, u_ref[...],
                             preferred_element_type=jnp.float32)   # (Cin, B*L_out)

            cin, bl = xm.shape
            zcol = jnp.zeros((cin, 1), jnp.float32)
            # shifted conv taps via lane shifts + per-sample boundary masks
            prev = jnp.concatenate([zcol, xm[:, : bl - 1]], axis=1) * mf_ref[...]
            nxt = jnp.concatenate([xm[:, 1:], zcol], axis=1) * ml_ref[...]

            # K=3 conv as three MXU matmuls with f32 accumulation
            y = (jnp.dot(w_ref[0], prev, preferred_element_type=jnp.float32)
                 + jnp.dot(w_ref[1], xm, preferred_element_type=jnp.float32)
                 + jnp.dot(w_ref[2], nxt, preferred_element_type=jnp.float32))

            # demodulation (precomputed per sample) + bias + leaky_relu*sqrt(2)
            y = y * dmat_ref[...] + b_ref[...]
            x = jnp.where(y >= 0.0, y, 0.2 * y) * sqrt2

        w_out_ref = refs[idx]
        b_out_ref = refs[idx + 1]
        o_ref = refs[idx + 2]
        out = jnp.dot(w_out_ref[...], x,
                      preferred_element_type=jnp.float32) + b_out_ref[...]
        o_ref[...] = out.astype(o_ref.dtype)

    return kernel


# --------------------------------------------------------------------------
# Generator: params + forward
# --------------------------------------------------------------------------
def init_generator(key, n_conv, n_up, dim_pose, channels, style_dim):
    layers = []
    for i in range(n_conv + n_up):
        in_c, out_c = channels[i], channels[i + 1]
        key, k1, k2, k3 = jax.random.split(key, 4)
        layers.append(dict(
            wmod=jax.random.normal(k1, (in_c, style_dim), jnp.float32) / math.sqrt(style_dim),
            bmod=jnp.ones((in_c, 1), jnp.float32),
            w=jax.random.normal(k2, (K, out_c, in_c), jnp.float32) / math.sqrt(in_c * K),
            b=0.1 * jax.random.normal(k3, (out_c, 1), jnp.float32),
            upsample=(i >= n_conv),
        ))
    last_c = channels[n_conv + n_up]
    key, k1, k2 = jax.random.split(key, 3)
    w_out = jax.random.normal(k1, (dim_pose, last_c), jnp.float32) / math.sqrt(last_c)
    b_out = 0.1 * jax.random.normal(k2, (dim_pose, 1), jnp.float32)
    return dict(layers=layers, w_out=w_out, b_out=b_out)


def generator_forward(params, inp, style, action_vecs=None, style_vecs=None):
    B, SI, L = inp.shape
    if action_vecs is not None:
        av = jnp.repeat(action_vecs[:, :, None], L, axis=-1)
        sp = jnp.concatenate([inp, av], axis=1)
    else:
        sp = inp
    gl = jnp.concatenate([style, style_vecs], axis=1) if style_vecs is not None else style

    layers = params["layers"]
    C0 = sp.shape[1]

    # lane-dense activation layout: (C, B*L), batch-major along lanes
    x2d = sp.transpose(1, 0, 2).reshape(C0, B * L)

    kernel_inputs = [x2d]
    in_specs = [_full_spec(x2d.shape)]
    upsample_flags = []

    L_cur = L
    for p in layers:
        up = bool(p["upsample"])
        L_in = L_cur
        L_out = 2 * L_in if up else L_in

        # hoisted (x-independent) per-batch quantities -> tiny XLA ops
        s = gl @ p["wmod"].T + p["bmod"][:, 0][None, :]                       # (B, cin)
        d = lax.rsqrt(jnp.einsum("koc,bc->bo", p["w"] ** 2, s ** 2) + 1e-8)   # (B, cout)
        smat = jnp.repeat(s.T, L_in, axis=1)                                  # (cin,  B*L_in)
        dmat = jnp.repeat(d.T, L_out, axis=1)                                 # (cout, B*L_out)
        mf, ml = _boundary_masks(B, L_out)                                    # (1, B*L_out) each

        layer_arrays = [smat, dmat, p["w"], p["b"], mf, ml]
        if up:
            layer_arrays.append(_upsample_matrix(B, L_in))                    # (B*L_in, B*L_out)

        for arr in layer_arrays:
            kernel_inputs.append(arr)
            in_specs.append(_full_spec(arr.shape))
        upsample_flags.append(up)
        L_cur = L_out

    kernel_inputs += [params["w_out"], params["b_out"]]
    in_specs += [_full_spec(params["w_out"].shape), _full_spec(params["b_out"].shape)]

    dim_pose = params["w_out"].shape[0]
    out2d_shape = (dim_pose, B * L_cur)

    out2d = pl.pallas_call(
        _make_generator_kernel(upsample_flags),
        out_shape=jax.ShapeDtypeStruct(out2d_shape, jnp.float32),
        grid_spec=pltpu.PrefetchScalarGridSpec(
            num_scalar_prefetch=0,
            grid=(1,),
            in_specs=in_specs,
            out_specs=_full_spec(out2d_shape),
        ),
        compiler_params=pltpu.CompilerParams(dimension_semantics=("arbitrary",)),
    )(*kernel_inputs)

    # layout plumbing back to the PyTorch NCL convention (outside the kernel)
    return out2d.reshape(dim_pose, B, L_cur).transpose(1, 0, 2)


# --------------------------------------------------------------------------
# Pure-JAX reference (for numerical check)
# --------------------------------------------------------------------------
def ref_forward(params, inp, style):
    sp = inp
    for p in params["layers"]:
        if p["upsample"]:
            sp = jnp.repeat(sp, 2, axis=-1)
        s = style @ p["wmod"].T + p["bmod"][:, 0][None, :]      # (B, Cin)
        xm = sp * s[:, :, None]
        xp = jnp.pad(xm, ((0, 0), (0, 0), (1, 1)))
        L = sp.shape[-1]
        acc = sum(jnp.einsum("oc,bcl->bol", p["w"][k], xp[:, :, k:k + L]) for k in range(K))
        d = lax.rsqrt(jnp.einsum("koc,bc->bo", p["w"] ** 2, s ** 2) + 1e-8)
        out = acc * d[:, :, None] + p["b"][None, :, :]
        sp = jnp.where(out >= 0.0, out, 0.2 * out) * math.sqrt(2.0)
    return jnp.einsum("oc,bcl->bol", params["w_out"], sp) + params["b_out"][None, :, :]


# --------------------------------------------------------------------------
if __name__ == "__main__":
    B, L = 2, 8
    n_conv, n_up = 2, 1
    channels = [16, 32, 32, 16]
    dim_pose = 8
    style_dim = 16

    key = jax.random.PRNGKey(0)
    key, kp, kx, ks = jax.random.split(key, 4)
    params = init_generator(kp, n_conv, n_up, dim_pose, channels, style_dim)

    x = jax.random.normal(kx, (B, channels[0], L), jnp.float32)      # (B, SI, L)
    style = jax.random.normal(ks, (B, style_dim), jnp.float32)

    out = generator_forward(params, x, style)
    out = jax.block_until_ready(out)

    assert out.shape == (B, dim_pose, L * (2 ** n_up)), out.shape

    ref = jax.block_until_ready(ref_forward(params, x, style))
    np.testing.assert_allclose(np.asarray(out), np.asarray(ref), rtol=5e-3, atol=5e-3)

    print("KERNEL_OK")
</pallas_src>

<mosaic_0001>
module attributes {stable_mosaic.version = 11 : i64} {
  func.func @kernel(%arg0: i32, %arg1: memref<16x16xf32, #tpu.memory_space<vmem>>, %arg2: memref<16x16xf32, #tpu.memory_space<vmem>>, %arg3: memref<32x16xf32, #tpu.memory_space<vmem>>, %arg4: memref<3x32x16xf32, #tpu.memory_space<vmem>>, %arg5: memref<32x1xf32, #tpu.memory_space<vmem>>, %arg6: memref<1x16xf32, #tpu.memory_space<vmem>>, %arg7: memref<1x16xf32, #tpu.memory_space<vmem>>, %arg8: memref<32x16xf32, #tpu.memory_space<vmem>>, %arg9: memref<32x16xf32, #tpu.memory_space<vmem>>, %arg10: memref<3x32x32xf32, #tpu.memory_space<vmem>>, %arg11: memref<32x1xf32, #tpu.memory_space<vmem>>, %arg12: memref<1x16xf32, #tpu.memory_space<vmem>>, %arg13: memref<1x16xf32, #tpu.memory_space<vmem>>, %arg14: memref<32x16xf32, #tpu.memory_space<vmem>>, %arg15: memref<16x32xf32, #tpu.memory_space<vmem>>, %arg16: memref<3x16x32xf32, #tpu.memory_space<vmem>>, %arg17: memref<16x1xf32, #tpu.memory_space<vmem>>, %arg18: memref<1x32xf32, #tpu.memory_space<vmem>>, %arg19: memref<1x32xf32, #tpu.memory_space<vmem>>, %arg20: memref<16x32xf32, #tpu.memory_space<vmem>>, %arg21: memref<8x16xf32, #tpu.memory_space<vmem>>, %arg22: memref<8x1xf32, #tpu.memory_space<vmem>>, %arg23: memref<8x32xf32, #tpu.memory_space<vmem>>) attributes {dimension_semantics = [#tpu.dimension_semantics<arbitrary>], iteration_bounds = array<i64: 1>, scalar_prefetch = 0 : i64, scratch_operands = 0 : i64, tpu.core_type = #tpu.core_type<tc>, window_params = [{pipeline_mode = #tpu.pipeline_mode<synchronous>, transform_indices = @transform_0, window_bounds = array<i64: 16, 16>}, {pipeline_mode = #tpu.pipeline_mode<synchronous>, transform_indices = @transform_1, window_bounds = array<i64: 16, 16>}, {pipeline_mode = #tpu.pipeline_mode<synchronous>, transform_indices = @transform_2, window_bounds = array<i64: 32, 16>}, {pipeline_mode = #tpu.pipeline_mode<synchronous>, transform_indices = @transform_3, window_bounds = array<i64: 3, 32, 16>}, {pipeline_mode = #tpu.pipeline_mode<synchronous>, transform_indices = @transform_4, window_bounds = array<i64: 32, 1>}, {pipeline_mode = #tpu.pipeline_mode<synchronous>, transform_indices = @transform_5, window_bounds = array<i64: 1, 16>}, {pipeline_mode = #tpu.pipeline_mode<synchronous>, transform_indices = @transform_6, window_bounds = array<i64: 1, 16>}, {pipeline_mode = #tpu.pipeline_mode<synchronous>, transform_indices = @transform_7, window_bounds = array<i64: 32, 16>}, {pipeline_mode = #tpu.pipeline_mode<synchronous>, transform_indices = @transform_8, window_bounds = array<i64: 32, 16>}, {pipeline_mode = #tpu.pipeline_mode<synchronous>, transform_indices = @transform_9, window_bounds = array<i64: 3, 32, 32>}, {pipeline_mode = #tpu.pipeline_mode<synchronous>, transform_indices = @transform_10, window_bounds = array<i64: 32, 1>}, {pipeline_mode = #tpu.pipeline_mode<synchronous>, transform_indices = @transform_11, window_bounds = array<i64: 1, 16>}, {pipeline_mode = #tpu.pipeline_mode<synchronous>, transform_indices = @transform_12, window_bounds = array<i64: 1, 16>}, {pipeline_mode = #tpu.pipeline_mode<synchronous>, transform_indices = @transform_13, window_bounds = array<i64: 32, 16>}, {pipeline_mode = #tpu.pipeline_mode<synchronous>, transform_indices = @transform_14, window_bounds = array<i64: 16, 32>}, {pipeline_mode = #tpu.pipeline_mode<synchronous>, transform_indices = @transform_15, window_bounds = array<i64: 3, 16, 32>}, {pipeline_mode = #tpu.pipeline_mode<synchronous>, transform_indices = @transform_16, window_bounds = array<i64: 16, 1>}, {pipeline_mode = #tpu.pipeline_mode<synchronous>, transform_indices = @transform_17, window_bounds = array<i64: 1, 32>}, {pipeline_mode = #tpu.pipeline_mode<synchronous>, transform_indices = @transform_18, window_bounds = array<i64: 1, 32>}, {pipeline_mode = #tpu.pipeline_mode<synchronous>, transform_indices = @transform_19, window_bounds = array<i64: 16, 32>}, {pipeline_mode = #tpu.pipeline_mode<synchronous>, transform_indices = @transform_20, window_bounds = array<i64: 8, 16>}, {pipeline_mode = #tpu.pipeline_mode<synchronous>, transform_indices = @transform_21, window_bounds = array<i64: 8, 1>}, {pipeline_mode = #tpu.pipeline_mode<synchronous>, transform_indices = @transform_22, window_bounds = array<i64: 8, 32>}]} {
    %c0 = arith.constant 0 : index
    %c0_0 = arith.constant 0 : index
    %0 = vector.load %arg1[%c0, %c0_0] : memref<16x16xf32, #tpu.memory_space<vmem>>, vector<16x16xf32>
    %c0_1 = arith.constant 0 : index
    %c0_2 = arith.constant 0 : index
    %1 = vector.load %arg2[%c0_1, %c0_2] : memref<16x16xf32, #tpu.memory_space<vmem>>, vector<16x16xf32>
    %2 = arith.mulf %0, %1 : vector<16x16xf32>
    %cst = arith.constant 0.000000e+00 : f32
    %3 = vector.broadcast %cst : f32 to vector<16x1xf32>
    %4 = vector.extract_strided_slice %2 {offsets = [0, 0], sizes = [16, 15], strides = [1, 1]} : vector<16x16xf32> to vector<16x15xf32>
    %5 = tpu.concatenate %3, %4 in 1 : vector<16x1xf32>, vector<16x15xf32> -> vector<16x16xf32>
    %c0_3 = arith.constant 0 : index
    %c0_4 = arith.constant 0 : index
    %6 = vector.load %arg6[%c0_3, %c0_4] : memref<1x16xf32, #tpu.memory_space<vmem>>, vector<1x16xf32>
    %7 = vector.broadcast %6 : vector<1x16xf32> to vector<16x16xf32>
    %8 = arith.mulf %5, %7 : vector<16x16xf32>
    %9 = vector.extract_strided_slice %2 {offsets = [0, 1], sizes = [16, 15], strides = [1, 1]} : vector<16x16xf32> to vector<16x15xf32>
    %10 = tpu.concatenate %9, %3 in 1 : vector<16x15xf32>, vector<16x1xf32> -> vector<16x16xf32>
    %c0_5 = arith.constant 0 : index
    %c0_6 = arith.constant 0 : index
    %11 = vector.load %arg7[%c0_5, %c0_6] : memref<1x16xf32, #tpu.memory_space<vmem>>, vector<1x16xf32>
    %12 = vector.broadcast %11 : vector<1x16xf32> to vector<16x16xf32>
    %13 = arith.mulf %10, %12 : vector<16x16xf32>
    %c0_7 = arith.constant 0 : index
    %c0_8 = arith.constant 0 : index
    %c0_9 = arith.constant 0 : index
    %14 = vector.load %arg4[%c0_7, %c0_8, %c0_9] : memref<3x32x16xf32, #tpu.memory_space<vmem>>, vector<1x32x16xf32>
    %15 = vector.shape_cast %14 : vector<1x32x16xf32> to vector<32x16xf32>
    %cst_10 = arith.constant dense<0.000000e+00> : vector<32x16xf32>
    %16 = tpu.matmul %15, %8, %cst_10 {dimension_numbers = #tpu.dot_dimension_numbers<[1], [0], [0], [1], [0, 0, 1, 1], [], []>} : vector<32x16xf32>, vector<16x16xf32>, vector<32x16xf32> -> vector<32x16xf32>
    %c1 = arith.constant 1 : index
    %c0_11 = arith.constant 0 : index
    %c0_12 = arith.constant 0 : index
    %17 = vector.load %arg4[%c1, %c0_11, %c0_12] : memref<3x32x16xf32, #tpu.memory_space<vmem>>, vector<1x32x16xf32>
    %18 = vector.shape_cast %17 : vector<1x32x16xf32> to vector<32x16xf32>
    %cst_13 = arith.constant dense<0.000000e+00> : vector<32x16xf32>
    %19 = tpu.matmul %18, %2, %cst_13 {dimension_numbers = #tpu.dot_dimension_numbers<[1], [0], [0], [1], [0, 0, 1, 1], [], []>} : vector<32x16xf32>, vector<16x16xf32>, vector<32x16xf32> -> vector<32x16xf32>
    %20 = arith.addf %16, %19 : vector<32x16xf32>
    %c2 = arith.constant 2 : index
    %c0_14 = arith.constant 0 : index
    %c0_15 = arith.constant 0 : index
    %21 = vector.load %arg4[%c2, %c0_14, %c0_15] : memref<3x32x16xf32, #tpu.memory_space<vmem>>, vector<1x32x16xf32>
    %22 = vector.shape_cast %21 : vector<1x32x16xf32> to vector<32x16xf32>
    %cst_16 = arith.constant dense<0.000000e+00> : vector<32x16xf32>
    %23 = tpu.matmul %22, %13, %cst_16 {dimension_numbers = #tpu.dot_dimension_numbers<[1], [0], [0], [1], [0, 0, 1, 1], [], []>} : vector<32x16xf32>, vector<16x16xf32>, vector<32x16xf32> -> vector<32x16xf32>
    %24 = arith.addf %20, %23 : vector<32x16xf32>
    %c0_17 = arith.constant 0 : index
    %c0_18 = arith.constant 0 : index
    %25 = vector.load %arg3[%c0_17, %c0_18] : memref<32x16xf32, #tpu.memory_space<vmem>>, vector<32x16xf32>
    %26 = arith.mulf %24, %25 : vector<32x16xf32>
    %c0_19 = arith.constant 0 : index
    %c0_20 = arith.constant 0 : index
    %27 = vector.load %arg5[%c0_19, %c0_20] : memref<32x1xf32, #tpu.memory_space<vmem>>, vector<32x1xf32>
    %28 = vector.broadcast %27 : vector<32x1xf32> to vector<32x16xf32>
    %29 = arith.addf %26, %28 : vector<32x16xf32>
    %cst_21 = arith.constant 0.000000e+00 : f32
    %30 = vector.broadcast %cst_21 : f32 to vector<32x16xf32>
    %31 = arith.cmpf oge, %29, %30 : vector<32x16xf32>
    %cst_22 = arith.constant 2.000000e-01 : f32
    %32 = vector.broadcast %cst_22 : f32 to vector<32x16xf32>
    %33 = arith.mulf %32, %29 : vector<32x16xf32>
    %34 = arith.select %31, %29, %33 : vector<32x16xi1>, vector<32x16xf32>
    %cst_23 = arith.constant 1.41421354 : f32
    %35 = vector.broadcast %cst_23 : f32 to vector<32x16xf32>
    %36 = arith.mulf %34, %35 : vector<32x16xf32>
    %c0_24 = arith.constant 0 : index
    %c0_25 = arith.constant 0 : index
    %37 = vector.load %arg8[%c0_24, %c0_25] : memref<32x16xf32, #tpu.memory_space<vmem>>, vector<32x16xf32>
    %38 = arith.mulf %36, %37 : vector<32x16xf32>
    %cst_26 = arith.constant 0.000000e+00 : f32
    %39 = vector.broadcast %cst_26 : f32 to vector<32x1xf32>
    %40 = vector.extract_strided_slice %38 {offsets = [0, 0], sizes = [32, 15], strides = [1, 1]} : vector<32x16xf32> to vector<32x15xf32>
    %41 = tpu.concatenate %39, %40 in 1 : vector<32x1xf32>, vector<32x15xf32> -> vector<32x16xf32>
    %c0_27 = arith.constant 0 : index
    %c0_28 = arith.constant 0 : index
    %42 = vector.load %arg12[%c0_27, %c0_28] : memref<1x16xf32, #tpu.memory_space<vmem>>, vector<1x16xf32>
    %43 = vector.broadcast %42 : vector<1x16xf32> to vector<32x16xf32>
    %44 = arith.mulf %41, %43 : vector<32x16xf32>
    %45 = vector.extract_strided_slice %38 {offsets = [0, 1], sizes = [32, 15], strides = [1, 1]} : vector<32x16xf32> to vector<32x15xf32>
    %46 = tpu.concatenate %45, %39 in 1 : vector<32x15xf32>, vector<32x1xf32> -> vector<32x16xf32>
    %c0_29 = arith.constant 0 : index
    %c0_30 = arith.constant 0 : index
    %47 = vector.load %arg13[%c0_29, %c0_30] : memref<1x16xf32, #tpu.memory_space<vmem>>, vector<1x16xf32>
    %48 = vector.broadcast %47 : vector<1x16xf32> to vector<32x16xf32>
    %49 = arith.mulf %46, %48 : vector<32x16xf32>
    %c0_31 = arith.constant 0 : index
    %c0_32 = arith.constant 0 : index
    %c0_33 = arith.constant 0 : index
    %50 = vector.load %arg10[%c0_31, %c0_32, %c0_33] : memref<3x32x32xf32, #tpu.memory_space<vmem>>, vector<1x32x32xf32>
    %51 = vector.shape_cast %50 : vector<1x32x32xf32> to vector<32x32xf32>
    %cst_34 = arith.constant dense<0.000000e+00> : vector<32x16xf32>
    %52 = tpu.matmul %51, %44, %cst_34 {dimension_numbers = #tpu.dot_dimension_numbers<[1], [0], [0], [1], [0, 0, 1, 1], [], []>} : vector<32x32xf32>, vector<32x16xf32>, vector<32x16xf32> -> vector<32x16xf32>
    %c1_35 = arith.constant 1 : index
    %c0_36 = arith.constant 0 : index
    %c0_37 = arith.constant 0 : index
    %53 = vector.load %arg10[%c1_35, %c0_36, %c0_37] : memref<3x32x32xf32, #tpu.memory_space<vmem>>, vector<1x32x32xf32>
    %54 = vector.shape_cast %53 : vector<1x32x32xf32> to vector<32x32xf32>
    %cst_38 = arith.constant dense<0.000000e+00> : vector<32x16xf32>
    %55 = tpu.matmul %54, %38, %cst_38 {dimension_numbers = #tpu.dot_dimension_numbers<[1], [0], [0], [1], [0, 0, 1, 1], [], []>} : vector<32x32xf32>, vector<32x16xf32>, vector<32x16xf32> -> vector<32x16xf32>
    %56 = arith.addf %52, %55 : vector<32x16xf32>
    %c2_39 = arith.constant 2 : index
    %c0_40 = arith.constant 0 : index
    %c0_41 = arith.constant 0 : index
    %57 = vector.load %arg10[%c2_39, %c0_40, %c0_41] : memref<3x32x32xf32, #tpu.memory_space<vmem>>, vector<1x32x32xf32>
    %58 = vector.shape_cast %57 : vector<1x32x32xf32> to vector<32x32xf32>
    %cst_42 = arith.constant dense<0.000000e+00> : vector<32x16xf32>
    %59 = tpu.matmul %58, %49, %cst_42 {dimension_numbers = #tpu.dot_dimension_numbers<[1], [0], [0], [1], [0, 0, 1, 1], [], []>} : vector<32x32xf32>, vector<32x16xf32>, vector<32x16xf32> -> vector<32x16xf32>
    %60 = arith.addf %56, %59 : vector<32x16xf32>
    %c0_43 = arith.constant 0 : index
    %c0_44 = arith.constant 0 : index
    %61 = vector.load %arg9[%c0_43, %c0_44] : memref<32x16xf32, #tpu.memory_space<vmem>>, vector<32x16xf32>
    %62 = arith.mulf %60, %61 : vector<32x16xf32>
    %c0_45 = arith.constant 0 : index
    %c0_46 = arith.constant 0 : index
    %63 = vector.load %arg11[%c0_45, %c0_46] : memref<32x1xf32, #tpu.memory_space<vmem>>, vector<32x1xf32>
    %64 = vector.broadcast %63 : vector<32x1xf32> to vector<32x16xf32>
    %65 = arith.addf %62, %64 : vector<32x16xf32>
    %cst_47 = arith.constant 0.000000e+00 : f32
    %66 = vector.broadcast %cst_47 : f32 to vector<32x16xf32>
    %67 = arith.cmpf oge, %65, %66 : vector<32x16xf32>
    %cst_48 = arith.constant 2.000000e-01 : f32
    %68 = vector.broadcast %cst_48 : f32 to vector<32x16xf32>
    %69 = arith.mulf %68, %65 : vector<32x16xf32>
    %70 = arith.select %67, %65, %69 : vector<32x16xi1>, vector<32x16xf32>
    %cst_49 = arith.constant 1.41421354 : f32
    %71 = vector.broadcast %cst_49 : f32 to vector<32x16xf32>
    %72 = arith.mulf %70, %71 : vector<32x16xf32>
    %c0_50 = arith.constant 0 : index
    %c0_51 = arith.constant 0 : index
    %73 = vector.load %arg14[%c0_50, %c0_51] : memref<32x16xf32, #tpu.memory_space<vmem>>, vector<32x16xf32>
    %74 = arith.mulf %72, %73 : vector<32x16xf32>
    %c0_52 = arith.constant 0 : index
    %c0_53 = arith.constant 0 : index
    %75 = vector.load %arg20[%c0_52, %c0_53] : memref<16x32xf32, #tpu.memory_space<vmem>>, vector<16x32xf32>
    %cst_54 = arith.constant dense<0.000000e+00> : vector<32x32xf32>
    %76 = tpu.matmul %74, %75, %cst_54 {dimension_numbers = #tpu.dot_dimension_numbers<[1], [0], [0], [1], [0, 0, 1, 1], [], []>} : vector<32x16xf32>, vector<16x32xf32>, vector<32x32xf32> -> vector<32x32xf32>
    %cst_55 = arith.constant 0.000000e+00 : f32
    %77 = vector.broadcast %cst_55 : f32 to vector<32x1xf32>
    %78 = vector.extract_strided_slice %76 {offsets = [0, 0], sizes = [32, 31], strides = [1, 1]} : vector<32x32xf32> to vector<32x31xf32>
    %79 = tpu.concatenate %77, %78 in 1 : vector<32x1xf32>, vector<32x31xf32> -> vector<32x32xf32>
    %c0_56 = arith.constant 0 : index
    %c0_57 = arith.constant 0 : index
    %80 = vector.load %arg18[%c0_56, %c0_57] : memref<1x32xf32, #tpu.memory_space<vmem>>, vector<1x32xf32>
    %81 = vector.broadcast %80 : vector<1x32xf32> to vector<32x32xf32>
    %82 = arith.mulf %79, %81 : vector<32x32xf32>
    %83 = vector.extract_strided_slice %76 {offsets = [0, 1], sizes = [32, 31], strides = [1, 1]} : vector<32x32xf32> to vector<32x31xf32>
    %84 = tpu.concatenate %83, %77 in 1 : vector<32x31xf32>, vector<32x1xf32> -> vector<32x32xf32>
    %c0_58 = arith.constant 0 : index
    %c0_59 = arith.constant 0 : index
    %85 = vector.load %arg19[%c0_58, %c0_59] : memref<1x32xf32, #tpu.memory_space<vmem>>, vector<1x32xf32>
    %86 = vector.broadcast %85 : vector<1x32xf32> to vector<32x32xf32>
    %87 = arith.mulf %84, %86 : vector<32x32xf32>
    %c0_60 = arith.constant 0 : index
    %c0_61 = arith.constant 0 : index
    %c0_62 = arith.constant 0 : index
    %88 = vector.load %arg16[%c0_60, %c0_61, %c0_62] : memref<3x16x32xf32, #tpu.memory_space<vmem>>, vector<1x16x32xf32>
    %89 = vector.shape_cast %88 : vector<1x16x32xf32> to vector<16x32xf32>
    %cst_63 = arith.constant dense<0.000000e+00> : vector<16x32xf32>
    %90 = tpu.matmul %89, %82, %cst_63 {dimension_numbers = #tpu.dot_dimension_numbers<[1], [0], [0], [1], [0, 0, 1, 1], [], []>} : vector<16x32xf32>, vector<32x32xf32>, vector<16x32xf32> -> vector<16x32xf32>
    %c1_64 = arith.constant 1 : index
    %c0_65 = arith.constant 0 : index
    %c0_66 = arith.constant 0 : index
    %91 = vector.load %arg16[%c1_64, %c0_65, %c0_66] : memref<3x16x32xf32, #tpu.memory_space<vmem>>, vector<1x16x32xf32>
    %92 = vector.shape_cast %91 : vector<1x16x32xf32> to vector<16x32xf32>
    %cst_67 = arith.constant dense<0.000000e+00> : vector<16x32xf32>
    %93 = tpu.matmul %92, %76, %cst_67 {dimension_numbers = #tpu.dot_dimension_numbers<[1], [0], [0], [1], [0, 0, 1, 1], [], []>} : vector<16x32xf32>, vector<32x32xf32>, vector<16x32xf32> -> vector<16x32xf32>
    %94 = arith.addf %90, %93 : vector<16x32xf32>
    %c2_68 = arith.constant 2 : index
    %c0_69 = arith.constant 0 : index
    %c0_70 = arith.constant 0 : index
    %95 = vector.load %arg16[%c2_68, %c0_69, %c0_70] : memref<3x16x32xf32, #tpu.memory_space<vmem>>, vector<1x16x32xf32>
    %96 = vector.shape_cast %95 : vector<1x16x32xf32> to vector<16x32xf32>
    %cst_71 = arith.constant dense<0.000000e+00> : vector<16x32xf32>
    %97 = tpu.matmul %96, %87, %cst_71 {dimension_numbers = #tpu.dot_dimension_numbers<[1], [0], [0], [1], [0, 0, 1, 1], [], []>} : vector<16x32xf32>, vector<32x32xf32>, vector<16x32xf32> -> vector<16x32xf32>
    %98 = arith.addf %94, %97 : vector<16x32xf32>
    %c0_72 = arith.constant 0 : index
    %c0_73 = arith.constant 0 : index
    %99 = vector.load %arg15[%c0_72, %c0_73] : memref<16x32xf32, #tpu.memory_space<vmem>>, vector<16x32xf32>
    %100 = arith.mulf %98, %99 : vector<16x32xf32>
    %c0_74 = arith.constant 0 : index
    %c0_75 = arith.constant 0 : index
    %101 = vector.load %arg17[%c0_74, %c0_75] : memref<16x1xf32, #tpu.memory_space<vmem>>, vector<16x1xf32>
    %102 = vector.broadcast %101 : vector<16x1xf32> to vector<16x32xf32>
    %103 = arith.addf %100, %102 : vector<16x32xf32>
    %cst_76 = arith.constant 0.000000e+00 : f32
    %104 = vector.broadcast %cst_76 : f32 to vector<16x32xf32>
    %105 = arith.cmpf oge, %103, %104 : vector<16x32xf32>
    %cst_77 = arith.constant 2.000000e-01 : f32
    %106 = vector.broadcast %cst_77 : f32 to vector<16x32xf32>
    %107 = arith.mulf %106, %103 : vector<16x32xf32>
    %108 = arith.select %105, %103, %107 : vector<16x32xi1>, vector<16x32xf32>
    %cst_78 = arith.constant 1.41421354 : f32
    %109 = vector.broadcast %cst_78 : f32 to vector<16x32xf32>
    %110 = arith.mulf %108, %109 : vector<16x32xf32>
    %c0_79 = arith.constant 0 : index
    %c0_80 = arith.constant 0 : index
    %111 = vector.load %arg21[%c0_79, %c0_80] : memref<8x16xf32, #tpu.memory_space<vmem>>, vector<8x16xf32>
    %cst_81 = arith.constant dense<0.000000e+00> : vector<8x32xf32>
    %112 = tpu.matmul %111, %110, %cst_81 {dimension_numbers = #tpu.dot_dimension_numbers<[1], [0], [0], [1], [0, 0, 1, 1], [], []>} : vector<8x16xf32>, vector<16x32xf32>, vector<8x32xf32> -> vector<8x32xf32>
    %c0_82 = arith.constant 0 : index
    %c0_83 = arith.constant 0 : index
    %113 = vector.load %arg22[%c0_82, %c0_83] : memref<8x1xf32, #tpu.memory_space<vmem>>, vector<8x1xf32>
    %114 = vector.broadcast %113 : vector<8x1xf32> to vector<8x32xf32>
    %115 = arith.addf %112, %114 : vector<8x32xf32>
    %c0_84 = arith.constant 0 : index
    %c0_85 = arith.constant 0 : index
    %116 = vector.load %arg23[%c0_84, %c0_85] : memref<8x32xf32, #tpu.memory_space<vmem>>, vector<8x32xf32>
    tpu.vector_store %arg23[%c0_84, %c0_85], %115 {strides = array<i32>} : memref<8x32xf32, #tpu.memory_space<vmem>>, vector<8x32xf32>,
    return
  }
  func.func @transform_0(%arg0: i32) -> (i32, i32) {
    %c0_i32 = arith.constant 0 : i32
    %c0_i32_0 = arith.constant 0 : i32
    %c0_i32_1 = arith.constant 0 : i32
    return %c0_i32, %c0_i32_0 : i32, i32
  }
  func.func @transform_1(%arg0: i32) -> (i32, i32) {
    %c0_i32 = arith.constant 0 : i32
    %c0_i32_0 = arith.constant 0 : i32
    %c0_i32_1 = arith.constant 0 : i32
    return %c0_i32, %c0_i32_0 : i32, i32
  }
  func.func @transform_2(%arg0: i32) -> (i32, i32) {
    %c0_i32 = arith.constant 0 : i32
    %c0_i32_0 = arith.constant 0 : i32
    %c0_i32_1 = arith.constant 0 : i32
    return %c0_i32, %c0_i32_0 : i32, i32
  }
  func.func @transform_3(%arg0: i32) -> (i32, i32, i32) {
    %c0_i32 = arith.constant 0 : i32
    %c0_i32_0 = arith.constant 0 : i32
    %c0_i32_1 = arith.constant 0 : i32
    %c0_i32_2 = arith.constant 0 : i32
    return %c0_i32, %c0_i32_0, %c0_i32_1 : i32, i32, i32
  }
  func.func @transform_4(%arg0: i32) -> (i32, i32) {
    %c0_i32 = arith.constant 0 : i32
    %c0_i32_0 = arith.constant 0 : i32
    %c0_i32_1 = arith.constant 0 : i32
    return %c0_i32, %c0_i32_0 : i32, i32
  }
  func.func @transform_5(%arg0: i32) -> (i32, i32) {
    %c0_i32 = arith.constant 0 : i32
    %c0_i32_0 = arith.constant 0 : i32
    %c0_i32_1 = arith.constant 0 : i32
    return %c0_i32, %c0_i32_0 : i32, i32
  }
  func.func @transform_6(%arg0: i32) -> (i32, i32) {
    %c0_i32 = arith.constant 0 : i32
    %c0_i32_0 = arith.constant 0 : i32
    %c0_i32_1 = arith.constant 0 : i32
    return %c0_i32, %c0_i32_0 : i32, i32
  }
  func.func @transform_7(%arg0: i32) -> (i32, i32) {
    %c0_i32 = arith.constant 0 : i32
    %c0_i32_0 = arith.constant 0 : i32
    %c0_i32_1 = arith.constant 0 : i32
    return %c0_i32, %c0_i32_0 : i32, i32
  }
  func.func @transform_8(%arg0: i32) -> (i32, i32) {
    %c0_i32 = arith.constant 0 : i32
    %c0_i32_0 = arith.constant 0 : i32
    %c0_i32_1 = arith.constant 0 : i32
    return %c0_i32, %c0_i32_0 : i32, i32
  }
  func.func @transform_9(%arg0: i32) -> (i32, i32, i32) {
    %c0_i32 = arith.constant 0 : i32
    %c0_i32_0 = arith.constant 0 : i32
    %c0_i32_1 = arith.constant 0 : i32
    %c0_i32_2 = arith.constant 0 : i32
    return %c0_i32, %c0_i32_0, %c0_i32_1 : i32, i32, i32
  }
  func.func @transform_10(%arg0: i32) -> (i32, i32) {
    %c0_i32 = arith.constant 0 : i32
    %c0_i32_0 = arith.constant 0 : i32
    %c0_i32_1 = arith.constant 0 : i32
    return %c0_i32, %c0_i32_0 : i32, i32
  }
  func.func @transform_11(%arg0: i32) -> (i32, i32) {
    %c0_i32 = arith.constant 0 : i32
    %c0_i32_0 = arith.constant 0 : i32
    %c0_i32_1 = arith.constant 0 : i32
    return %c0_i32, %c0_i32_0 : i32, i32
  }
  func.func @transform_12(%arg0: i32) -> (i32, i32) {
    %c0_i32 = arith.constant 0 : i32
    %c0_i32_0 = arith.constant 0 : i32
    %c0_i32_1 = arith.constant 0 : i32
    return %c0_i32, %c0_i32_0 : i32, i32
  }
  func.func @transform_13(%arg0: i32) -> (i32, i32) {
    %c0_i32 = arith.constant 0 : i32
    %c0_i32_0 = arith.constant 0 : i32
    %c0_i32_1 = arith.constant 0 : i32
    return %c0_i32, %c0_i32_0 : i32, i32
  }
  func.func @transform_14(%arg0: i32) -> (i32, i32) {
    %c0_i32 = arith.constant 0 : i32
    %c0_i32_0 = arith.constant 0 : i32
    %c0_i32_1 = arith.constant 0 : i32
    return %c0_i32, %c0_i32_0 : i32, i32
  }
  func.func @transform_15(%arg0: i32) -> (i32, i32, i32) {
    %c0_i32 = arith.constant 0 : i32
    %c0_i32_0 = arith.constant 0 : i32
    %c0_i32_1 = arith.constant 0 : i32
    %c0_i32_2 = arith.constant 0 : i32
    return %c0_i32, %c0_i32_0, %c0_i32_1 : i32, i32, i32
  }
  func.func @transform_16(%arg0: i32) -> (i32, i32) {
    %c0_i32 = arith.constant 0 : i32
    %c0_i32_0 = arith.constant 0 : i32
    %c0_i32_1 = arith.constant 0 : i32
    return %c0_i32, %c0_i32_0 : i32, i32
  }
  func.func @transform_17(%arg0: i32) -> (i32, i32) {
    %c0_i32 = arith.constant 0 : i32
    %c0_i32_0 = arith.constant 0 : i32
    %c0_i32_1 = arith.constant 0 : i32
    return %c0_i32, %c0_i32_0 : i32, i32
  }
  func.func @transform_18(%arg0: i32) -> (i32, i32) {
    %c0_i32 = arith.constant 0 : i32
    %c0_i32_0 = arith.constant 0 : i32
    %c0_i32_1 = arith.constant 0 : i32
    return %c0_i32, %c0_i32_0 : i32, i32
  }
  func.func @transform_19(%arg0: i32) -> (i32, i32) {
    %c0_i32 = arith.constant 0 : i32
    %c0_i32_0 = arith.constant 0 : i32
    %c0_i32_1 = arith.constant 0 : i32
    return %c0_i32, %c0_i32_0 : i32, i32
  }
  func.func @transform_20(%arg0: i32) -> (i32, i32) {
    %c0_i32 = arith.constant 0 : i32
    %c0_i32_0 = arith.constant 0 : i32
    %c0_i32_1 = arith.constant 0 : i32
    return %c0_i32, %c0_i32_0 : i32, i32
  }
  func.func @transform_21(%arg0: i32) -> (i32, i32) {
    %c0_i32 = arith.constant 0 : i32
    %c0_i32_0 = arith.constant 0 : i32
    %c0_i32_1 = arith.constant 0 : i32
    return %c0_i32, %c0_i32_0 : i32, i32
  }
  func.func @transform_22(%arg0: i32) -> (i32, i32) {
    %c0_i32 = arith.constant 0 : i32
    %c0_i32_0 = arith.constant 0 : i32
    %c0_i32_1 = arith.constant 0 : i32
    return %c0_i32, %c0_i32_0 : i32, i32
  }
}

</mosaic_0001>

<bundles_post_ra>
// kernel: tpu_custom_call.1
= control target key start
LH: loop header
LB: loop body
LE: loop exit
PB: predicated region body
PF: predicated region fallthrough
CT: control target
= control target key end

     0   :  { %s1342_s0 = inlined_call_operand.vmem [shape: f32[16,16], index: 0, kind: input, shape index: {}]   ;;  %s1343_s1 = inlined_call_operand.vmem [shape: f32[16,16], index: 1, kind: input, shape index: {}]   ;;  %s1344_s2 = inlined_call_operand.vmem [shape: f32[32,16], index: 2, kind: input, shape index: {}]   ;;  %s1345_s3 = inlined_call_operand.vmem [shape: f32[3,32,16], index: 3, kind: input, shape index: {}]   ;;  %s1346_s4 = inlined_call_operand.vmem [shape: f32[32,1], index: 4, kind: input, shape index: {}]   ;;  %s1347_s5 = inlined_call_operand.vmem [shape: f32[1,16], index: 5, kind: input, shape index: {}]   ;;  %s1348_s6 = inlined_call_operand.vmem [shape: f32[1,16], index: 6, kind: input, shape index: {}]   ;;  %s1349_s7 = inlined_call_operand.vmem [shape: f32[32,16], index: 7, kind: input, shape index: {}]   ;;  %s1350_s8 = inlined_call_operand.vmem [shape: f32[32,16], index: 8, kind: input, shape index: {}]   ;;  %s1351_s9 = inlined_call_operand.vmem [shape: f32[3,32,32], index: 9, kind: input, shape index: {}]   ;;  %s1352_s10 = inlined_call_operand.vmem [shape: f32[32,1], index: 10, kind: input, shape index: {}]   ;;  %s1353_s11 = inlined_call_operand.vmem [shape: f32[1,16], index: 11, kind: input, shape index: {}]   ;;  %s1354_s12 = inlined_call_operand.vmem [shape: f32[1,16], index: 12, kind: input, shape index: {}]   ;;  %s1355_s13 = inlined_call_operand.vmem [shape: f32[32,16], index: 13, kind: input, shape index: {}]   ;;  %s1356_s14 = inlined_call_operand.vmem [shape: f32[16,32], index: 14, kind: input, shape index: {}]   ;;  %s1357_s15 = inlined_call_operand.vmem [shape: f32[3,16,32], index: 15, kind: input, shape index: {}]   ;;  %s1358_s16 = inlined_call_operand.vmem [shape: f32[16,1], index: 16, kind: input, shape index: {}]   ;;  %s1359_s17 = inlined_call_operand.vmem [shape: f32[1,32], index: 17, kind: input, shape index: {}]   ;;  %s1360_s18 = inlined_call_operand.vmem [shape: f32[1,32], index: 18, kind: input, shape index: {}]   ;;  %s1361_s19 = inlined_call_operand.vmem [shape: f32[16,32], index: 19, kind: input, shape index: {}]   ;;  %s1362_s20 = inlined_call_operand.vmem [shape: f32[8,16], index: 20, kind: input, shape index: {}]   ;;  %s1363_s21 = inlined_call_operand.vmem [shape: f32[8,1], index: 21, kind: input, shape index: {}]   ;;  %s1364_s22 = inlined_call_operand.hbm [shape: f32[8,32], index: 22, kind: output, shape index: {}]  }
   0x1   :  { %1371 = sst [smem:[#allocation5_spill]] %s1342_s0 }
   0x2   :  { %1372 = sst [smem:[#allocation6_spill]] %s1343_s1 }
   0x3   :  { %1373 = sst [smem:[#allocation7_spill]] %s1344_s2 }
   0x4   :  { %1374 = sst [smem:[#allocation8_spill]] %s1345_s3 }
   0x5   :  { %1375 = sst [smem:[#allocation9_spill]] %s1346_s4 }
   0x6   :  { %1376 = sst [smem:[#allocation10_spill]] %s1347_s5 }
   0x7   :  { %1377 = sst [smem:[#allocation11_spill]] %s1348_s6 }
   0x8   :  { %1378 = sst [smem:[#allocation12_spill]] %s1356_s14 }
   0x9   :  { %s1379_s29 = sld [smem:[#allocation5_spill]]  ;;  %s928_s24 = smov 1  }
   0xa   :  { %s1380_s14 = sld [smem:[#allocation6_spill]]  ;;  %s929_s6 = smov 127  }
   0xf   :  { %v73_v0 = vld [vmem:[%s1379_s29 + $0x8] sm:$0xff]  ;;  %v72_v2 = vld [vmem:[%s1379_s29] sm:$0xff] }
  0x10   :  { %v75_v1 = vld [vmem:[%s1380_s14 + $0x8] sm:$0xff]  ;;  %v74_v4 = vld [vmem:[%s1380_s14] sm:$0xff] }
  0x11   :  { %v77_v3 = vmul.f32 %v75_v1, %v73_v0 }
  0x13   :  { %82 = vrot.lane.b32.xlu1 %v77_v3, %s928_s24  ;;  %97 = vrot.lane.b32.xlu0 %v77_v3, %s929_s6 }
  0x14   :  { %27 = vsyncpa [#allocation3], 0  ;;  %v76_v5 = vmul.f32 %v74_v4, %v72_v2  ;;  %887 = vmatpush.msra.mxu2 %v77_v3  ;;  %146 = vmatpush.msra.mxu0 %v77_v3  ;;  %s1381_s2 = sld [smem:[#allocation8_spill]]  ;;  %vm119_vm0 = vcmask 130048   ;;  %vm86_vm1 = vcmask 7168   ;;  %vm101_vm2 = vcmask 121856  }
  0x15   :  { %s1382_s23 = sld [smem:[#allocation9_spill]]  ;;  %v930_v13 = vmov 0   ;;  %v305_v60 = vld [vmem:[%s1349_s7 + $0x8] sm:$0xff]  ;;  %vm373_vm7 = vcmask 261120   ;;  %vm649_vm12 = vcmask 252928   ;;  %s823_s28 = sshll.u32 %s1364_s22, 4  ;;  %s824_s28 = int_to_ptr.hbm [resolvable:$true] %s823_s28 }
  0x16   :  { %888 = vmatpush.msra.mxu2 %v76_v5  ;;  %147 = vmatpush.msra.mxu0 %v76_v5  ;;  %s1383_s25 = sld [smem:[#allocation11_spill]] }
  0x17   :  { %s1384_s27 = sld [smem:[#allocation10_spill]]  ;;  %895 = vset.pattern.permute.xlu1 %v930_v13  ;;  %894 = vset.pattern.permute.xlu0 %v930_v13 }
  0x18   :  { %893 = vset.pattern.permute.xlu2 %v930_v13  ;;  %v306_v13 = vld [vmem:[%s1349_s7 + $0x10] sm:$0xff] }
  0x1a   :  { %v835_v6 = vld [vmem:[%s1381_s2 + $0x38] sm:$0xff]  ;;  %v832_v7 = vld [vmem:[%s1381_s2 + $0x20] sm:$0xff]  ;;  %v833_v8 = vld [vmem:[%s1381_s2 + $0x28] sm:$0xff] }
  0x1b   :  { %80 = vrot.lane.b32.xlu1 %v76_v5, %s928_s24  ;;  %95 = vrot.lane.b32.xlu0 %v76_v5, %s929_s6  ;;  %v834_v9 = vld [vmem:[%s1381_s2 + $0x30] sm:$0xff]  ;;  %v260_v10 = vld [vmem:[%s1382_s23] sm:$0xff] }
  0x1c   :  { %839 = vmatmul.msk.f32.vlgmr.msra.gmra.mxu2 %vm119_vm0, %v835_v6  ;;  %836 = vmatmul.msk.f32.vlgmr.msra.gmra.mxu0 %vm119_vm0, %v832_v7  ;;  %v896_v11 = vld [vmem:[%s1383_s25] ss:$0 sm:$0xff]  ;;  %v261_v20 = vld [vmem:[%s1382_s23 + $0x8] sm:$0xff]  ;;  %v263_v21 = vld [vmem:[%s1382_s23 + $0x18] sm:$0xff] }
  0x1d   :  { %v897_v12 = vld [vmem:[%s1384_s27] ss:$0 sm:$0xff]  ;;  %281 = vperm.xlu2 %893, %v263_v21   ;;  %v262_v30 = vld [vmem:[%s1382_s23 + $0x10] sm:$0xff]  ;;  %v111_v31 = vld [vmem:[%s1381_s2 + $0x8] sm:$0xff]  ;;  %s1385_s27 = sld [smem:[#allocation7_spill]] }
  0x1e   :  { %v110_v28 = vld [vmem:[%s1381_s2] sm:$0xff]  ;;  %v845_v32 = vld [vmem:[%s1381_s2 + $0x48] sm:$0xff]  ;;  %v112_v33 = vld [vmem:[%s1381_s2 + $0x10] sm:$0xff] }
  0x1f   :  { %v844_v29 = vld [vmem:[%s1381_s2 + $0x40] sm:$0xff]  ;;  %v846_v34 = vld [vmem:[%s1381_s2 + $0x50] sm:$0xff]  ;;  %v113_v35 = vld [vmem:[%s1381_s2 + $0x18] sm:$0xff] }
  0x20   :  { %v847_v36 = vld [vmem:[%s1381_s2 + $0x58] sm:$0xff] }
  0x23   :  { %266 = vperm.xlu1 %895, %v260_v10   ;;  %271 = vperm.xlu0 %894, %v261_v20   ;;  %v253_v45 = vld [vmem:[%s1385_s27 + $0x8] sm:$0xff]  ;;  %v254_v57 = vld [vmem:[%s1385_s27 + $0x10] sm:$0xff]  ;;  %v252_v0 = vld [vmem:[%s1385_s27] sm:$0xff] }
  0x24   :  { %837 = vmatmul.msk.f32.gmra.mxu0 %vm119_vm0, %v833_v8  ;;  %v255_v10 = vld [vmem:[%s1385_s27 + $0x18] sm:$0xff] }
  0x25   :  { %276 = vperm.xlu2 %893, %v262_v30   ;;  %v516_v30 = vld [vmem:[%s1352_s10 + $0x10] sm:$0xff] }
  0x2c   :  { %838 = vmatmul.msk.f32.gmra.mxu0 %vm119_vm0, %v834_v9 }
  0x77   :  { %v282_v46 = vpop.permute.xlu2 %281 }
  0x7f   :  { %v277_v1 = vpop.permute.xlu2 %276 }
  0x85   :  { %v83_v14 = vpop.permute.xlu1 %82  ;;  %v98_v15 = vpop.permute.xlu0 %97 }
  0x86   :  { %v88_v16 = vsel %vm86_vm1, 0.0, %v83_v14  ;;  %v103_v17 = vsel %vm101_vm2, %v98_v15, 0.0 }
  0x87   :  { %v109_v18 = vmul.f32 %v896_v11, %v103_v17  ;;  %v94_v19 = vmul.f32 %v897_v12, %v88_v16 }
  0x89   :  { %233 = vmatpush.msrb.mxu2 %v109_v18  ;;  %187 = vmatpush.msra.mxu1 %v94_v19 }
  0x8d   :  { %v81_v22 = vpop.permute.xlu1 %80  ;;  %v96_v23 = vpop.permute.xlu0 %95 }
  0x8e   :  { %v87_v24 = vsel %vm86_vm1, 0.0, %v81_v22  ;;  %v102_v25 = vsel %vm101_vm2, %v96_v23, 0.0  ;;  %v307_v22 = vld [vmem:[%s1349_s7 + $0x18] sm:$0xff] }
  0x8f   :  { %v93_v26 = vmul.f32 %v897_v12, %v87_v24  ;;  %v108_v27 = vmul.f32 %v896_v11, %v102_v25 }
  0x91   :  { %188 = vmatpush.msra.mxu1 %v93_v26  ;;  %234 = vmatpush.msrb.mxu2 %v108_v27  ;;  %v515_v26 = vld [vmem:[%s1352_s10 + $0x8] sm:$0xff] }
  0x92   :  { %840 = vmatmul.msk.f32.vlgmr.msra.gmra.mxu1 %vm119_vm0, %v110_v28  ;;  %848 = vmatmul.msk.f32.vlgmr.msrb.gmra.mxu2 %vm119_vm0, %v844_v29  ;;  %v304_v28 = vld [vmem:[%s1349_s7] sm:$0xff] }
  0x95   :  { %v272_v48 = vpop.permute.xlu0 %271  ;;  %v267_v8 = vpop.permute.xlu1 %266 }
  0x99   :  { %v149_v38 = vpop.f32.mrf.mxu0 }
  0x9a   :  { %841 = vmatmul.msk.f32.gmra.mxu1 %vm119_vm0, %v111_v31  ;;  %849 = vmatmul.msk.f32.gmra.mxu2 %vm119_vm0, %v845_v32  ;;  %v514_v31 = vld [vmem:[%s1352_s10] sm:$0xff]  ;;  %v517_v32 = vld [vmem:[%s1352_s10 + $0x18] sm:$0xff]  ;;  %s1386_s10 = sld [smem:[#allocation12_spill]] }
  0x9f   :  { %v158_v37 = vpop.f32.mrf.mxu2 }
  0xa1   :  { %v152_v41 = vpop.f32.mrf.mxu0 }
  0xa2   :  { %842 = vmatmul.msk.f32.gmra.mxu1 %vm119_vm0, %v112_v33  ;;  %850 = vmatmul.msk.f32.gmra.mxu2 %vm119_vm0, %v846_v34  ;;  %v852_v33 = vld [vmem:[%s1351_s9 + $0x20] sm:$0xff] }
  0xa3   :  { %v898_v34 = vld [vmem:[%s1353_s11] ss:$0 sm:$0xff] }
  0xa9   :  { %v155_v50 = vpop.f32.mrf.mxu0 }
  0xaa   :  { %843 = vmatmul.msk.f32.gmra.mxu1 %vm119_vm0, %v113_v35  ;;  %851 = vmatmul.msk.f32.gmra.mxu2 %vm119_vm0, %v847_v36 }
 0x10f   :  { %v190_v39 = vpop.f32.mrf.mxu1 }
 0x110   :  { %v191_v54 = vadd.f32 %v190_v39, %v149_v38  ;;  %v853_v38 = vld [vmem:[%s1351_s9 + $0x28] sm:$0xff]  ;;  %v899_v39 = vld [vmem:[%s1354_s12] ss:$0 sm:$0xff] }
 0x115   :  { %v236_v40 = vpop.f32.mrf.mxu2 }
 0x116   :  { %v248_v62 = vadd.f32 %v236_v40, %v191_v54 }
 0x117   :  { %v193_v42 = vpop.f32.mrf.mxu1 }
 0x118   :  { %v194_v43 = vadd.f32 %v193_v42, %v152_v41  ;;  %v256_v5 = vmul.f32 %v252_v0, %v248_v62 }
 0x11a   :  { %v284_v15 = vadd.f32 %v267_v8, %v256_v5  ;;  %v866_v5 = vld [vmem:[%s1351_s9 + $0x50] sm:$0xff]  ;;  %v566_v8 = vld [vmem:[%s1361_s19] sm:$0xff] }
 0x11c   :  { %v292_v19 = vmul.f32 0.2, %v284_v15  ;;  %vm288_vm6 = vcmp.ge.f32.partialorder %v284_v15, 0.0 }
 0x11d   :  { %v239_v44 = vpop.f32.mrf.mxu2 }
 0x11e   :  { %v249_v47 = vadd.f32 %v239_v44, %v194_v43  ;;  %v296_v24 = vsel %vm288_vm6, %v284_v15, %v292_v19  ;;  %v854_v43 = vld [vmem:[%s1351_s9 + $0x30] sm:$0xff]  ;;  %v506_v15 = vld [vmem:[%s1350_s8] sm:$0xff] }
 0x11f   :  { %v196_v49 = vpop.f32.mrf.mxu1  ;;  %v300_v27 = vmul.f32 1.4142135, %v296_v24  ;;  %v507_v24 = vld [vmem:[%s1350_s8 + $0x8] sm:$0xff] }
 0x120   :  { %v257_v51 = vmul.f32 %v253_v45, %v249_v47  ;;  %v197_v53 = vadd.f32 %v196_v49, %v155_v50  ;;  %v855_v50 = vld [vmem:[%s1351_s9 + $0x38] sm:$0xff] }
 0x121   :  { %v308_v29 = vmul.f32 %v304_v28, %v300_v27  ;;  %v558_v27 = vld [vmem:[%s1355_s13] sm:$0xff] }
 0x122   :  { %v285_v52 = vadd.f32 %v272_v48, %v257_v51 }
 0x124   :  { %vm289_vm3 = vcmp.ge.f32.partialorder %v285_v52, 0.0  ;;  %v293_v55 = vmul.f32 0.2, %v285_v52 }
 0x125   :  { %v242_v56 = vpop.f32.mrf.mxu2 }
 0x126   :  { %v297_v58 = vsel %vm289_vm3, %v285_v52, %v293_v55  ;;  %v250_v59 = vadd.f32 %v242_v56, %v197_v53  ;;  %v364_v55 = vld [vmem:[%s1351_s9] sm:$0xff] }
 0x127   :  { %v301_v61 = vmul.f32 1.4142135, %v297_v58  ;;  %v199_v2 = vpop.f32.mrf.mxu1 }
 0x128   :  { %v258_v63 = vmul.f32 %v254_v57, %v250_v59  ;;  %v200_v7 = vadd.f32 %v199_v2, %v158_v37  ;;  %v366_v2 = vld [vmem:[%s1351_s9 + $0x10] sm:$0xff] }
 0x129   :  { %v309_v3 = vmul.f32 %v305_v60, %v301_v61  ;;  %v365_v61 = vld [vmem:[%s1351_s9 + $0x8] sm:$0xff] }
 0x12a   :  { %v286_v4 = vadd.f32 %v277_v1, %v258_v63  ;;  %v864_v1 = vld [vmem:[%s1351_s9 + $0x40] sm:$0xff] }
 0x12b   :  { %318 = vrot.lane.b32.xlu0 %v309_v3, %s928_s24 }
 0x12c   :  { %v294_v6 = vmul.f32 0.2, %v286_v4  ;;  %vm290_vm4 = vcmp.ge.f32.partialorder %v286_v4, 0.0 }
 0x12d   :  { %v245_v9 = vpop.f32.mrf.mxu2 }
 0x12e   :  { %v251_v11 = vadd.f32 %v245_v9, %v200_v7  ;;  %v298_v12 = vsel %vm290_vm4, %v286_v4, %v294_v6  ;;  %v367_v4 = vld [vmem:[%s1351_s9 + $0x18] sm:$0xff]  ;;  %v567_v7 = vld [vmem:[%s1361_s19 + $0x8] sm:$0xff] }
 0x12f   :  { %v302_v14 = vmul.f32 1.4142135, %v298_v12  ;;  %v867_v6 = vld [vmem:[%s1351_s9 + $0x58] sm:$0xff]  ;;  %594 = vmatpush.msra.mxu2 %v567_v7  ;;  %v763_v7 = vld [vmem:[%s1358_s16] sm:$0xff] }
 0x130   :  { %v259_v16 = vmul.f32 %v255_v10, %v251_v11 }
 0x131   :  { %v310_v17 = vmul.f32 %v306_v13, %v302_v14  ;;  %595 = vmatpush.msra.mxu2 %v566_v8  ;;  %v876_v8 = vld [vmem:[%s1357_s15 + $0x10] sm:$0xff] }
 0x132   :  { %v287_v18 = vadd.f32 %v282_v46, %v259_v16 }
 0x133   :  { %342 = vrot.lane.b32.xlu0 %v309_v3, %s929_s6  ;;  %320 = vrot.lane.b32.xlu1 %v310_v17, %s928_s24 }
 0x134   :  { %v295_v20 = vmul.f32 0.2, %v287_v18  ;;  %vm291_vm5 = vcmp.ge.f32.partialorder %v287_v18, 0.0 }
 0x136   :  { %v299_v21 = vsel %vm291_vm5, %v287_v18, %v295_v20 }
 0x137   :  { %v303_v23 = vmul.f32 1.4142135, %v299_v21 }
 0x139   :  { %v311_v25 = vmul.f32 %v307_v22, %v303_v23 }
 0x13b   :  { %322 = vrot.lane.b32.xlu2 %v311_v25, %s928_s24  ;;  %398 = vmatpush.msra.mxu3 %v311_v25 }
 0x13c   :  { %525 = vperm.xlu0 %894, %v515_v26   ;;  %344 = vrot.lane.b32.xlu1 %v310_v17, %s929_s6 }
 0x13d   :  { %399 = vmatpush.msra.mxu3 %v310_v17 }
 0x13f   :  { %400 = vmatpush.msra.mxu3 %v309_v3  ;;  %v865_v3 = vld [vmem:[%s1351_s9 + $0x48] sm:$0xff] }
 0x141   :  { %401 = vmatpush.msra.mxu3 %v308_v29 }
 0x142   :  { %856 = vmatmul.msk.f32.vlgmr.msra.gmra.mxu3 %vm373_vm7, %v852_v33 }
 0x143   :  { %346 = vrot.lane.b32.xlu2 %v311_v25, %s929_s6 }
 0x144   :  { %340 = vrot.lane.b32.xlu1 %v308_v29, %s929_s6 }
 0x14a   :  { %857 = vmatmul.msk.f32.gmra.mxu3 %vm373_vm7, %v853_v38 }
 0x14b   :  { %316 = vrot.lane.b32.xlu2 %v308_v29, %s928_s24 }
 0x14c   :  { %530 = vperm.xlu1 %895, %v516_v30  }
 0x152   :  { %858 = vmatmul.msk.f32.gmra.mxu3 %vm373_vm7, %v854_v43 }
 0x153   :  { %520 = vperm.xlu2 %893, %v514_v31  }
 0x15a   :  { %859 = vmatmul.msk.f32.gmra.mxu3 %vm373_vm7, %v855_v50 }
 0x15b   :  { %535 = vperm.xlu2 %893, %v517_v32  }
 0x195   :  { %v323_v35 = vpop.permute.xlu2 %322 }
 0x196   :  { %v331_v36 = vsel %vm86_vm1, 0.0, %v323_v35 }
 0x197   :  { %v339_v37 = vmul.f32 %v898_v34, %v331_v36 }
 0x199   :  { %439 = vmatpush.msrb.mxu0 %v339_v37  ;;  %v508_v37 = vld [vmem:[%s1350_s8 + $0x10] sm:$0xff] }
 0x19d   :  { %v347_v40 = vpop.permute.xlu2 %346  ;;  %v319_v44 = vpop.permute.xlu0 %318 }
 0x19e   :  { %v355_v41 = vsel %vm101_vm2, %v347_v40, 0.0  ;;  %v329_v47 = vsel %vm86_vm1, 0.0, %v319_v44  ;;  %v559_v40 = vld [vmem:[%s1355_s13 + $0x8] sm:$0xff] }
 0x19f   :  { %v363_v42 = vmul.f32 %v899_v39, %v355_v41  ;;  %v337_v52 = vmul.f32 %v898_v34, %v329_v47 }
 0x1a1   :  { %485 = vmatpush.msrb.mxu1 %v363_v42 }
 0x1a5   :  { %v317_v45 = vpop.permute.xlu2 %316  ;;  %v321_v46 = vpop.permute.xlu1 %320 }
 0x1a6   :  { %v330_v48 = vsel %vm86_vm1, 0.0, %v321_v46  ;;  %v328_v51 = vsel %vm86_vm1, 0.0, %v317_v45  ;;  %v343_v53 = vpop.permute.xlu0 %342 }
 0x1a7   :  { %v338_v49 = vmul.f32 %v898_v34, %v330_v48  ;;  %v336_v54 = vmul.f32 %v898_v34, %v328_v51  ;;  %v353_v57 = vsel %vm101_vm2, %v343_v53, 0.0  ;;  %v509_v51 = vld [vmem:[%s1350_s8 + $0x18] sm:$0xff]  ;;  %s931_s8 = smov [#allocation2]  }
 0x1a8   :  { %v361_v60 = vmul.f32 %v899_v39, %v353_v57  ;;  %s821_s12 = sshll.u32 %s931_s8, 4  ;;  %s822_s12 = int_to_ptr.vmem [resolvable:$true] %s821_s12 }
 0x1a9   :  { %440 = vmatpush.msrb.mxu0 %v338_v49 }
 0x1ab   :  { %441 = vmatpush.msrb.mxu0 %v337_v52 }
 0x1ad   :  { %442 = vmatpush.msrb.mxu0 %v336_v54  ;;  %v521_v18 = vpop.permute.xlu2 %520  ;;  %v560_v54 = vld [vmem:[%s1355_s13 + $0x10] sm:$0xff] }
 0x1ae   :  { %v345_v56 = vpop.permute.xlu1 %344  ;;  %860 = vmatmul.msk.f32.vlgmr.msrb.gmra.mxu0 %vm373_vm7, %v364_v55  ;;  %v526_v31 = vpop.permute.xlu0 %525 }
 0x1af   :  { %v354_v58 = vsel %vm101_vm2, %v345_v56, 0.0 }
 0x1b0   :  { %v362_v59 = vmul.f32 %v899_v39, %v354_v58 }
 0x1b2   :  { %486 = vmatpush.msrb.mxu1 %v362_v59 }
 0x1b4   :  { %487 = vmatpush.msrb.mxu1 %v361_v60 }
 0x1b5   :  { %v536_v57 = vpop.permute.xlu2 %535 }
 0x1b6   :  { %v341_v62 = vpop.permute.xlu1 %340  ;;  %861 = vmatmul.msk.f32.gmra.mxu0 %vm373_vm7, %v365_v61 }
 0x1b7   :  { %v352_v63 = vsel %vm101_vm2, %v341_v62, 0.0  ;;  %v561_v62 = vld [vmem:[%s1355_s13 + $0x18] sm:$0xff] }
 0x1b8   :  { %v360_v0 = vmul.f32 %v899_v39, %v352_v63 }
 0x1ba   :  { %488 = vmatpush.msrb.mxu1 %v360_v0 }
 0x1bb   :  { %868 = vmatmul.msk.f32.vlgmr.msrb.gmra.mxu1 %vm373_vm7, %v864_v1 }
 0x1be   :  { %862 = vmatmul.msk.f32.gmra.mxu0 %vm373_vm7, %v366_v2  ;;  %v531_v45 = vpop.permute.xlu1 %530 }
 0x1c3   :  { %869 = vmatmul.msk.f32.gmra.mxu1 %vm373_vm7, %v865_v3 }
 0x1c5   :  { %v403_v9 = vpop.f32.mrf.mxu3 }
 0x1c6   :  { %863 = vmatmul.msk.f32.gmra.mxu0 %vm373_vm7, %v367_v4  ;;  %v764_v4 = vld [vmem:[%s1358_s16 + $0x8] sm:$0xff] }
 0x1cb   :  { %870 = vmatmul.msk.f32.gmra.mxu1 %vm373_vm7, %v866_v5 }
 0x1cd   :  { %v406_v12 = vpop.f32.mrf.mxu3 }
 0x1d3   :  { %871 = vmatmul.msk.f32.gmra.mxu1 %vm373_vm7, %v867_v6  ;;  %v786_v6 = vld [vmem:[%s1363_s21] sm:$0xff] }
 0x1d5   :  { %v409_v22 = vpop.f32.mrf.mxu3 }
 0x1dd   :  { %v412_v41 = vpop.f32.mrf.mxu3 }
 0x22b   :  { %v444_v10 = vpop.f32.mrf.mxu0 }
 0x22c   :  { %v445_v11 = vadd.f32 %v444_v10, %v403_v9  ;;  %v877_v9 = vld [vmem:[%s1357_s15 + $0x18] sm:$0xff] }
 0x233   :  { %v447_v13 = vpop.f32.mrf.mxu0 }
 0x234   :  { %v448_v20 = vadd.f32 %v447_v13, %v406_v12  ;;  %v901_v13 = vld [vmem:[%s1360_s18] ss:$0 sm:$0xff] }
 0x238   :  { %v490_v14 = vpop.f32.mrf.mxu1 }
 0x239   :  { %v502_v16 = vadd.f32 %v490_v14, %v445_v11 }
 0x23b   :  { %v510_v17 = vmul.f32 %v506_v15, %v502_v16  ;;  %v450_v25 = vpop.f32.mrf.mxu0  ;;  %v900_v15 = vld [vmem:[%s1359_s17] ss:$0 sm:$0xff] }
 0x23c   :  { %v451_v34 = vadd.f32 %v450_v25, %v409_v22 }
 0x23d   :  { %v538_v19 = vadd.f32 %v521_v18, %v510_v17 }
 0x23f   :  { %vm542_vm8 = vcmp.ge.f32.partialorder %v538_v19, 0.0  ;;  %v546_v21 = vmul.f32 0.2, %v538_v19 }
 0x240   :  { %v493_v23 = vpop.f32.mrf.mxu1 }
 0x241   :  { %v550_v26 = vsel %vm542_vm8, %v538_v19, %v546_v21  ;;  %v503_v28 = vadd.f32 %v493_v23, %v448_v20 }
 0x242   :  { %v554_v29 = vmul.f32 1.4142135, %v550_v26 }
 0x243   :  { %v511_v30 = vmul.f32 %v507_v24, %v503_v28  ;;  %v453_v42 = vpop.f32.mrf.mxu0 }
 0x244   :  { %v562_v32 = vmul.f32 %v558_v27, %v554_v29  ;;  %v454_v48 = vadd.f32 %v453_v42, %v412_v41 }
 0x245   :  { %v539_v33 = vadd.f32 %v526_v31, %v511_v30  ;;  %v662_v30 = vld [vmem:[%s1357_s15] sm:$0xff] }
 0x246   :  { %872 = vmatmul.msk.f32.vlgmr.msra.gmra.mxu2 %vm119_vm0, %v562_v32 }
 0x247   :  { %v547_v35 = vmul.f32 0.2, %v539_v33  ;;  %vm543_vm9 = vcmp.ge.f32.partialorder %v539_v33, 0.0 }
 0x248   :  { %v496_v36 = vpop.f32.mrf.mxu1 }
 0x249   :  { %v504_v38 = vadd.f32 %v496_v36, %v451_v34  ;;  %v551_v39 = vsel %vm543_vm9, %v539_v33, %v547_v35  ;;  %v663_v36 = vld [vmem:[%s1357_s15 + $0x8] sm:$0xff] }
 0x24a   :  { %v555_v43 = vmul.f32 1.4142135, %v551_v39  ;;  %v883_v39 = vld [vmem:[%s1357_s15 + $0x28] sm:$0xff] }
 0x24b   :  { %v512_v44 = vmul.f32 %v508_v37, %v504_v38  ;;  %v882_v38 = vld [vmem:[%s1357_s15 + $0x20] sm:$0xff] }
 0x24c   :  { %v563_v46 = vmul.f32 %v559_v40, %v555_v43 }
 0x24d   :  { %v540_v47 = vadd.f32 %v531_v45, %v512_v44 }
 0x24e   :  { %873 = vmatmul.msk.f32.gmra.mxu2 %vm119_vm0, %v563_v46  ;;  %v759_v46 = vld [vmem:[%s1386_s10] sm:$0xff] }
 0x24f   :  { %v548_v49 = vmul.f32 0.2, %v540_v47  ;;  %vm544_vm10 = vcmp.ge.f32.partialorder %v540_v47, 0.0 }
 0x250   :  { %v499_v50 = vpop.f32.mrf.mxu1 }
 0x251   :  { %v505_v52 = vadd.f32 %v499_v50, %v454_v48  ;;  %v552_v53 = vsel %vm544_vm10, %v540_v47, %v548_v49 }
 0x252   :  { %v556_v55 = vmul.f32 1.4142135, %v552_v53 }
 0x253   :  { %v513_v56 = vmul.f32 %v509_v51, %v505_v52  ;;  %v760_v52 = vld [vmem:[%s1386_s10 + $0x8] sm:$0xff] }
 0x254   :  { %v564_v58 = vmul.f32 %v560_v54, %v556_v55 }
 0x255   :  { %v541_v59 = vadd.f32 %v536_v57, %v513_v56 }
 0x256   :  { %874 = vmatmul.msk.f32.gmra.mxu2 %vm119_vm0, %v564_v58 }
 0x257   :  { %v549_v60 = vmul.f32 0.2, %v541_v59  ;;  %vm545_vm11 = vcmp.ge.f32.partialorder %v541_v59, 0.0 }
 0x259   :  { %v553_v61 = vsel %vm545_vm11, %v541_v59, %v549_v60 }
 0x25a   :  { %v557_v63 = vmul.f32 1.4142135, %v553_v61 }
 0x25c   :  { %v565_v0 = vmul.f32 %v561_v62, %v557_v63 }
 0x25e   :  { %875 = vmatmul.msk.f32.gmra.mxu2 %vm119_vm0, %v565_v0  ;;  %v785_v0 = vld [vmem:[%s1362_s20] sm:$0xff] }
 0x2c9   :  { %v597_v1 = vpop.f32.mrf.mxu2 }
 0x2d1   :  { %v600_v2 = vpop.f32.mrf.mxu2 }
 0x2d2   :  { %615 = vrot.lane.b32.xlu2 %v600_v2, %s928_s24 }
 0x2d9   :  { %v603_v3 = vpop.f32.mrf.mxu2 }
 0x2da   :  { %641 = vrot.lane.b32.xlu2 %v603_v3, %s929_s6  ;;  %617 = vrot.lane.b32.xlu1 %v603_v3, %s928_s24 }
 0x2e1   :  { %v606_v5 = vpop.f32.mrf.mxu2 }
 0x2e2   :  { %772 = vperm.xlu2 %893, %v764_v4   ;;  %643 = vrot.lane.b32.xlu1 %v606_v5, %s929_s6 }
 0x2e3   :  { %619 = vrot.lane.b32.xlu0 %v606_v5, %s928_s24  ;;  %685 = vmatpush.msrb.mxu3 %v606_v5 }
 0x2e5   :  { %686 = vmatpush.msrb.mxu3 %v603_v3 }
 0x2e7   :  { %687 = vmatpush.msrb.mxu3 %v600_v2 }
 0x2e9   :  { %688 = vmatpush.msrb.mxu3 %v597_v1 }
 0x2ea   :  { %637 = vrot.lane.b32.xlu1 %v597_v1, %s929_s6  ;;  %878 = vmatmul.msk.f32.vlgmr.msrb.gmra.mxu3 %vm373_vm7, %v876_v8 }
 0x2eb   :  { %613 = vrot.lane.b32.xlu0 %v597_v1, %s928_s24 }
 0x2f2   :  { %789 = vperm.xlu1 %895, %v786_v6   ;;  %879 = vmatmul.msk.f32.gmra.mxu3 %vm373_vm7, %v877_v9 }
 0x2f3   :  { %639 = vrot.lane.b32.xlu0 %v600_v2, %s929_s6 }
 0x2fb   :  { %767 = vperm.xlu0 %894, %v763_v7  }
 0x32c   :  { %v616_v10 = vpop.permute.xlu2 %615 }
 0x32d   :  { %v626_v23 = vsel %vm86_vm1, 0.0, %v616_v10 }
 0x32e   :  { %v634_v26 = vmul.f32 %v900_v15, %v626_v23 }
 0x334   :  { %v642_v12 = vpop.permute.xlu2 %641 }
 0x335   :  { %v652_v16 = vsel %vm649_vm12, %v642_v12, 0.0 }
 0x336   :  { %v660_v24 = vmul.f32 %v901_v13, %v652_v16 }
 0x33c   :  { %v773_v56 = vpop.permute.xlu2 %772 }
 0x34c   :  { %v618_v11 = vpop.permute.xlu1 %617 }
 0x34d   :  { %v627_v19 = vsel %vm86_vm1, 0.0, %v618_v11 }
 0x34e   :  { %v635_v25 = vmul.f32 %v900_v15, %v627_v19 }
 0x354   :  { %v644_v14 = vpop.permute.xlu1 %643 }
 0x355   :  { %v653_v17 = vsel %vm649_vm12, %v644_v14, 0.0  ;;  %v620_v18 = vpop.permute.xlu0 %619 }
 0x356   :  { %v661_v20 = vmul.f32 %v901_v13, %v653_v17  ;;  %v628_v21 = vsel %vm86_vm1, 0.0, %v620_v18 }
 0x357   :  { %v636_v22 = vmul.f32 %v900_v15, %v628_v21 }
 0x358   :  { %746 = vmatpush.msra.mxu0 %v661_v20 }
 0x359   :  { %714 = vmatpush.msra.mxu3 %v636_v22 }
 0x35a   :  { %747 = vmatpush.msra.mxu0 %v660_v24 }
 0x35b   :  { %715 = vmatpush.msra.mxu3 %v635_v25 }
 0x35c   :  { %v638_v31 = vpop.permute.xlu1 %637 }
 0x35d   :  { %v614_v27 = vpop.permute.xlu0 %613  ;;  %716 = vmatpush.msra.mxu3 %v634_v26  ;;  %v650_v33 = vsel %vm649_vm12, %v638_v31, 0.0 }
 0x35e   :  { %v625_v28 = vsel %vm86_vm1, 0.0, %v614_v27  ;;  %v658_v37 = vmul.f32 %v901_v13, %v650_v33 }
 0x35f   :  { %v633_v29 = vmul.f32 %v900_v15, %v625_v28 }
 0x361   :  { %717 = vmatpush.msra.mxu3 %v633_v29 }
 0x362   :  { %880 = vmatmul.msk.f32.vlgmr.msra.gmra.mxu3 %vm373_vm7, %v662_v30 }
 0x364   :  { %v790_v1 = vpop.permute.xlu1 %789 }
 0x365   :  { %v640_v32 = vpop.permute.xlu0 %639 }
 0x366   :  { %v651_v34 = vsel %vm649_vm12, %v640_v32, 0.0 }
 0x367   :  { %v659_v35 = vmul.f32 %v901_v13, %v651_v34 }
 0x369   :  { %748 = vmatpush.msra.mxu0 %v659_v35 }
 0x36a   :  { %881 = vmatmul.msk.f32.gmra.mxu3 %vm373_vm7, %v663_v36 }
 0x36b   :  { %749 = vmatpush.msra.mxu0 %v658_v37 }
 0x36c   :  { %884 = vmatmul.msk.f32.vlgmr.msra.gmra.mxu0 %vm373_vm7, %v882_v38 }
 0x36d   :  { %v690_v40 = vpop.f32.mrf.mxu3  ;;  %v768_v50 = vpop.permute.xlu0 %767 }
 0x374   :  { %885 = vmatmul.msk.f32.gmra.mxu0 %vm373_vm7, %v883_v39 }
 0x375   :  { %v693_v41 = vpop.f32.mrf.mxu3 }
 0x3e5   :  { %v719_v42 = vpop.f32.mrf.mxu3 }
 0x3e6   :  { %v720_v43 = vadd.f32 %v719_v42, %v690_v40 }
 0x3e9   :  { %v751_v44 = vpop.f32.mrf.mxu0 }
 0x3ea   :  { %v757_v45 = vadd.f32 %v751_v44, %v720_v43 }
 0x3ec   :  { %v761_v48 = vmul.f32 %v759_v46, %v757_v45 }
 0x3ed   :  { %v722_v47 = vpop.f32.mrf.mxu3 }
 0x3ee   :  { %v723_v49 = vadd.f32 %v722_v47, %v693_v41  ;;  %v775_v53 = vadd.f32 %v768_v50, %v761_v48 }
 0x3f0   :  { %v779_v58 = vmul.f32 0.2, %v775_v53  ;;  %vm777_vm13 = vcmp.ge.f32.partialorder %v775_v53, 0.0 }
 0x3f1   :  { %v754_v51 = vpop.f32.mrf.mxu0 }
 0x3f2   :  { %v758_v54 = vadd.f32 %v754_v51, %v723_v49  ;;  %v781_v61 = vsel %vm777_vm13, %v775_v53, %v779_v58 }
 0x3f3   :  { %v783_v63 = vmul.f32 1.4142135, %v781_v61 }
 0x3f4   :  { %v762_v55 = vmul.f32 %v760_v52, %v758_v54 }
 0x3f6   :  { %v776_v57 = vadd.f32 %v773_v56, %v762_v55 }
 0x3f8   :  { %vm778_vm14 = vcmp.ge.f32.partialorder %v776_v57, 0.0  ;;  %v780_v59 = vmul.f32 0.2, %v776_v57 }
 0x3fa   :  { %v782_v60 = vsel %vm778_vm14, %v776_v57, %v780_v59 }
 0x3fb   :  { %v784_v62 = vmul.f32 1.4142135, %v782_v60 }
 0x3fd   :  { %809 = vmatpush.msra.mxu1 %v784_v62 }
 0x3ff   :  { %810 = vmatpush.msra.mxu1 %v783_v63 }
 0x400   :  { %886 = vmatmul.msk.f32.vlgmr.msra.gmra.mxu1 %vm119_vm0, %v785_v0 }
 0x47d   :  { %v812_v2 = vpop.f32.mrf.mxu1 }
 0x47e   :  { %v813_v3 = vadd.f32 %v812_v2, %v790_v1 }
 0x480   :  { %815 = vst.msk [vmem:[#allocation2] sm:$0xff] %vm373_vm7, %v813_v3 }
 0x481   :  { %826 = dma.vmem_to_hbm [thread:$0]  %s822_s12, 128, %s824_s28, [#allocation3]  }
 0x482   :  { %926 = dma.done.wait [#allocation3], 128  }
 0x483   :  { %927 = vsyncadd [#allocation3], 4294967168 }
 0x484   :  { %831 = vsyncpa [#allocation3], 1 }

</bundles_post_ra>
